<compile_context>
chip_gen: v7x
topology: tpu7x:2x2x1
jax: 0.10.0
libtpu: 0.0.40
codegen_flags: <defaults>
</compile_context>

<pallas_src>
import jax
import jax.numpy as jnp
from jax.experimental import pallas as pl
from jax.experimental.pallas import tpu as pltpu


_INV_SQRT2 = 0.7071067811865476


def _round_up(x, m):
    return (x + m - 1) // m * m


def _cdiv(a, b):
    return (a + b - 1) // b


def _gelu_exact_f32(h):
    # Exact erf-based GELU in f32 (matches torch.nn.GELU() default).
    return 0.5 * h * (1.0 + jax.lax.erf(h * _INV_SQRT2))


def _ffn_kernel_acc_out(x_ref, w1_ref, b1_ref, w2_ref, b2_ref, o_ref):
    """f32 output path: accumulate H-streamed partial products directly into o_ref."""
    j = pl.program_id(1)

    @pl.when(j == 0)
    def _init():
        o_ref[...] = jnp.zeros_like(o_ref)

    # Linear 1 for this H-slice: MXU matmul (operands may be bf16), f32 accumulate.
    h = jnp.dot(x_ref[...], w1_ref[...], preferred_element_type=jnp.float32)
    h = h + b1_ref[...].astype(jnp.float32)          # f32 bias add
    h = _gelu_exact_f32(h)                            # f32 GELU
    # Dropout(p=0.0) is identity — nothing to do.
    # TODO(synk): non-zero dropout probability (training mode) not implemented.
    # Linear 2 partial product for this H-slice, accumulated in f32 in o_ref.
    o_ref[...] += jnp.dot(h.astype(w2_ref.dtype), w2_ref[...],
                          preferred_element_type=jnp.float32)

    @pl.when(j == pl.num_programs(1) - 1)
    def _finalize():
        o_ref[...] += b2_ref[...].astype(jnp.float32)


def _ffn_kernel_scratch(x_ref, w1_ref, b1_ref, w2_ref, b2_ref, o_ref, acc_ref):
    """Narrow-output path (e.g. bf16 out): f32 VMEM scratch accumulator, cast once."""
    j = pl.program_id(1)

    @pl.when(j == 0)
    def _init():
        acc_ref[...] = jnp.zeros_like(acc_ref)

    h = jnp.dot(x_ref[...], w1_ref[...], preferred_element_type=jnp.float32)
    h = h + b1_ref[...].astype(jnp.float32)
    h = _gelu_exact_f32(h)
    # TODO(synk): non-zero dropout probability (training mode) not implemented.
    acc_ref[...] += jnp.dot(h.astype(w2_ref.dtype), w2_ref[...],
                            preferred_element_type=jnp.float32)

    @pl.when(j == pl.num_programs(1) - 1)
    def _finalize():
        o_ref[...] = (acc_ref[...] + b2_ref[...].astype(jnp.float32)).astype(o_ref.dtype)


def _vmem_capacity_bytes():
    # Generation-aware VMEM capacity (128 MiB on v5e/v6e, 64 MiB per-TC on v7x).
    try:
        info = pltpu.get_tpu_info()
        cap = getattr(info, "vmem_capacity_bytes", None)
        if cap:
            return int(cap)
    except Exception:
        pass
    return 64 * 1024 * 1024   # conservative fallback (v7x-sized)


def _pad2d(a, rows, cols, dtype):
    a = a.astype(dtype)
    r, c = a.shape
    if r != rows or c != cols:   # skip the copy entirely when already aligned
        a = jnp.pad(a, ((0, rows - r), (0, cols - c)))
    return a


def feedforward(x, w1, b1, w2, b2, *, tile_m=512, tile_h=512,
                compute_dtype=jnp.bfloat16, weight_buffers=2):
    """FeedForward forward pass.

    x : (batch, seq, dim); w1: (dim, hidden); b1: (hidden,); w2: (hidden, dim); b2: (dim,)

    compute_dtype: dtype fed to the MXU (bf16 by default — ~3-6x faster matmul
        and half the weight HBM traffic; accumulation, bias add and GELU stay
        f32).  Pass jnp.float32 for bit-exact f32 math.
    weight_buffers: pipeline depth for the streamed W1/W2 slices.  Sweep 2 vs 3
        on v5e/v6e if xprof shows exposed weight DMA; keep 2 on v7x (VMEM).
    """
    B, S, D = x.shape
    H = w1.shape[1]
    M = B * S

    out_dtype = x.dtype
    cdt = jnp.dtype(compute_dtype)
    use_scratch = out_dtype != jnp.float32   # f32 out -> accumulate straight into o_ref

    # ---- lane/sublane-friendly padded shapes --------------------------------
    D_pad = _round_up(D, 128)
    H_pad = _round_up(H, 128)
    tile_h = max(128, min(_round_up(tile_h, 128), H_pad))
    tile_m_max = max(8, _round_up(tile_m, 8))

    # ---- generation-aware VMEM budget with auto-shrinking tiles --------------
    vmem_cap = _vmem_capacity_bytes()
    vmem_budget = int(0.85 * vmem_cap)        # headroom for compiler temporaries
    itc = cdt.itemsize
    ito = jnp.dtype(out_dtype).itemsize
    wbuf = max(2, int(weight_buffers))

    def vmem_estimate(tm, th):
        tm = min(tm, _round_up(M, 8))
        return (2 * tm * D_pad * itc                      # x tile (double-buffered)
                + wbuf * D_pad * th * itc                 # W1 H-slice
                + wbuf * th * D_pad * itc                 # W2 H-slice
                + 2 * 8 * th * 4                          # b1 slice (sublane-padded)
                + 2 * 8 * D_pad * 4                       # b2
                + 2 * tm * D_pad * ito                    # output tile
                + (tm * D_pad * 4 if use_scratch else 0)  # f32 accumulator scratch
                + tm * th * 4)                            # f32 intermediate h

    while (vmem_estimate(tile_m_max, tile_h) > vmem_budget
           and (tile_h > 128 or tile_m_max > 128)):
        if tile_h > 128:
            tile_h = max(128, (tile_h // 2) // 128 * 128)
        else:
            tile_m_max = max(128, tile_m_max // 2)
    # TODO(synk): for very large D (>= 8k) also split D on a third grid axis
    # instead of keeping the full-D x tile / accumulator resident.

    H_pad = _round_up(H_pad, tile_h)

    # ---- balanced M tiling: minimal padding, even grid for megacore/v7x ------
    n_m = _cdiv(M, tile_m_max)
    if M >= 256 and n_m % 2 == 1:
        n_m += 1                       # even number of M tiles -> both TCs busy
    tile_m = _round_up(_cdiv(M, n_m), 8)
    M_pad = n_m * tile_m

    # ---- pad / cast operands (no-ops when already aligned) -------------------
    x2 = _pad2d(x.reshape(M, D), M_pad, D_pad, cdt)
    w1p = _pad2d(w1, D_pad, H_pad, cdt)
    w2p = _pad2d(w2, H_pad, D_pad, cdt)
    b1p = _pad2d(b1.reshape(1, H), 1, H_pad, jnp.float32)
    b2p = _pad2d(b2.reshape(1, D), 1, D_pad, jnp.float32)

    grid = (M_pad // tile_m, H_pad // tile_h)
    grid_m = grid[0]

    def _weight_spec(shape, index_map):
        # Optional deeper pipelining for the streamed weight slices (v5e/v6e).
        if wbuf > 2:
            return pl.BlockSpec(shape, index_map, pipeline_mode=pl.Buffered(wbuf))
        return pl.BlockSpec(shape, index_map)

    # Weights are re-streamed once per M tile -> account for it in the estimate.
    weight_bytes = (w1p.size + w2p.size) * itc + (b1p.size + b2p.size) * 4
    cost = pl.CostEstimate(
        flops=int(4 * M_pad * D_pad * H_pad),             # two matmuls
        transcendentals=int(M_pad * H_pad),               # erf in GELU
        bytes_accessed=int(x2.size * itc + grid_m * weight_bytes + M_pad * D_pad * ito),
    )

    est = vmem_estimate(tile_m, tile_h)
    vmem_limit = int(min(vmem_budget, max(32 * 1024 * 1024, int(1.5 * est))))

    if use_scratch:
        kernel = _ffn_kernel_scratch
        scratch_shapes = [pltpu.VMEM((tile_m, D_pad), jnp.float32)]
    else:
        kernel = _ffn_kernel_acc_out
        scratch_shapes = []

    out = pl.pallas_call(
        kernel,
        out_shape=jax.ShapeDtypeStruct((M_pad, D_pad), out_dtype),
        grid_spec=pltpu.PrefetchScalarGridSpec(
            num_scalar_prefetch=0,
            grid=grid,
            in_specs=[
                pl.BlockSpec((tile_m, D_pad), lambda i, j: (i, 0)),   # x tile
                _weight_spec((D_pad, tile_h), lambda i, j: (0, j)),   # W1 H-slice
                pl.BlockSpec((1, tile_h), lambda i, j: (0, j)),       # b1 H-slice
                _weight_spec((tile_h, D_pad), lambda i, j: (j, 0)),   # W2 H-slice
                pl.BlockSpec((1, D_pad), lambda i, j: (0, 0)),        # b2
            ],
            out_specs=pl.BlockSpec((tile_m, D_pad), lambda i, j: (i, 0)),
            scratch_shapes=scratch_shapes,
        ),
        compiler_params=pltpu.CompilerParams(
            dimension_semantics=("parallel", "arbitrary"),
            vmem_limit_bytes=vmem_limit,
        ),
        cost_estimate=cost,
    )(x2, w1p, b1p, w2p, b2p)

    if M_pad != M or D_pad != D:
        out = out[:M, :D]
    return out.reshape(B, S, D)


# ----------------------------- references & tests -----------------------------
def _reference_f32(x, w1, b1, w2, b2):
    x, w1, b1, w2, b2 = (a.astype(jnp.float32) for a in (x, w1, b1, w2, b2))
    h = jnp.einsum("bsd,dh->bsh", x, w1) + b1
    h = _gelu_exact_f32(h)
    return jnp.einsum("bsh,hd->bsd", h, w2) + b2


def _reference_matched(x, w1, b1, w2, b2, cdt):
    # Same dtype path as the kernel: low-precision MXU operands, f32 everything else.
    h = jnp.einsum("bsd,dh->bsh", x.astype(cdt), w1.astype(cdt),
                   preferred_element_type=jnp.float32) + b1.astype(jnp.float32)
    h = _gelu_exact_f32(h)
    return jnp.einsum("bsh,hd->bsd", h.astype(cdt), w2.astype(cdt),
                      preferred_element_type=jnp.float32) + b2.astype(jnp.float32)


def _make_inputs(key, B, S, D, H, dtype=jnp.float32):
    kx, k1, k2, k3, k4 = jax.random.split(key, 5)
    x = jax.random.normal(kx, (B, S, D), dtype=jnp.float32)
    lim1 = 1.0 / jnp.sqrt(jnp.float32(D))
    lim2 = 1.0 / jnp.sqrt(jnp.float32(H))
    w1 = jax.random.uniform(k1, (D, H), jnp.float32, -lim1, lim1)
    b1 = jax.random.uniform(k2, (H,), jnp.float32, -lim1, lim1)
    w2 = jax.random.uniform(k3, (H, D), jnp.float32, -lim2, lim2)
    b2 = jax.random.uniform(k4, (D,), jnp.float32, -lim2, lim2)
    return tuple(a.astype(dtype) for a in (x, w1, b1, w2, b2))


if __name__ == "__main__":
    key = jax.random.PRNGKey(0)
    k_a, k_b, k_c = jax.random.split(key, 3)

    # Test 1: module-consistent small shapes (batch=2, seq=8, dim=32, hidden=64),
    # default bf16 MXU path, f32 output accumulated directly into o_ref.
    x, w1, b1, w2, b2 = _make_inputs(k_a, 2, 8, 32, 64)
    out = jax.block_until_ready(feedforward(x, w1, b1, w2, b2))
    assert out.shape == x.shape and out.dtype == x.dtype
    ref_m = _reference_matched(x, w1, b1, w2, b2, jnp.bfloat16)
    ref_f = _reference_f32(x, w1, b1, w2, b2)
    assert jnp.allclose(out, ref_m, atol=1e-3, rtol=1e-3), "mismatch vs matched-precision ref (test 1)"
    assert jnp.allclose(out, ref_f, atol=5e-2, rtol=5e-2), "mismatch vs f32 ref (test 1)"

    # Test 2: non-aligned D/H/M with multiple H blocks (dim=40, hidden=300) in
    # exact f32 compute -> exercises padding + H-streamed accumulation, bit-level.
    x, w1, b1, w2, b2 = _make_inputs(k_b, 2, 7, 40, 300)
    out = jax.block_until_ready(
        feedforward(x, w1, b1, w2, b2, tile_h=128, compute_dtype=jnp.float32))
    assert out.shape == x.shape
    ref_f = _reference_f32(x, w1, b1, w2, b2)
    assert jnp.allclose(out, ref_f, atol=1e-5, rtol=1e-5), "mismatch vs f32 ref (test 2)"

    # Test 3: bf16 activations/weights (aligned D=128, H=256) -> exercises the
    # no-padding fast path and the f32-scratch / bf16-output kernel variant.
    x, w1, b1, w2, b2 = _make_inputs(k_c, 2, 8, 128, 256, dtype=jnp.bfloat16)
    out = jax.block_until_ready(feedforward(x, w1, b1, w2, b2))
    assert out.shape == x.shape and out.dtype == jnp.bfloat16
    ref_f = _reference_f32(x, w1, b1, w2, b2)
    assert jnp.allclose(out.astype(jnp.float32), ref_f, atol=5e-2, rtol=5e-2), \
        "mismatch vs f32 ref (test 3)"

    print("KERNEL_OK")
</pallas_src>

<mosaic_0001>
module attributes {stable_mosaic.version = 11 : i64} {
  func.func @_ffn_kernel_acc_out(%arg0: i32, %arg1: i32, %arg2: memref<16x128xbf16, #tpu.memory_space<vmem>>, %arg3: memref<128x128xbf16, #tpu.memory_space<vmem>>, %arg4: memref<1x128xf32, #tpu.memory_space<vmem>>, %arg5: memref<128x128xbf16, #tpu.memory_space<vmem>>, %arg6: memref<1x128xf32, #tpu.memory_space<vmem>>, %arg7: memref<16x128xf32, #tpu.memory_space<vmem>>) attributes {dimension_semantics = [#tpu.dimension_semantics<parallel>, #tpu.dimension_semantics<arbitrary>], iteration_bounds = array<i64: 1, 1>, scalar_prefetch = 0 : i64, scratch_operands = 0 : i64, tpu.core_type = #tpu.core_type<tc>, window_params = [{transform_indices = @transform_0, window_bounds = array<i64: 16, 128>}, {transform_indices = @transform_1, window_bounds = array<i64: 128, 128>}, {transform_indices = @transform_2, window_bounds = array<i64: 1, 128>}, {transform_indices = @transform_3, window_bounds = array<i64: 128, 128>}, {pipeline_mode = #tpu.pipeline_mode<synchronous>, transform_indices = @transform_4, window_bounds = array<i64: 1, 128>}, {transform_indices = @transform_5, window_bounds = array<i64: 16, 128>}]} {
    %c0_i32 = arith.constant 0 : i32
    %0 = arith.cmpi eq, %arg1, %c0_i32 : i32
    %1 = arith.extui %0 : i1 to i32
    %c0_i32_0 = arith.constant 0 : i32
    %2 = arith.cmpi ne, %1, %c0_i32_0 : i32
    scf.if %2 {
      %cst_18 = arith.constant 0.000000e+00 : f32
      %26 = vector.broadcast %cst_18 : f32 to vector<16x128xf32>
      %c0_19 = arith.constant 0 : index
      %c0_20 = arith.constant 0 : index
      %27 = vector.load %arg7[%c0_19, %c0_20] : memref<16x128xf32, #tpu.memory_space<vmem>>, vector<16x128xf32>
      tpu.vector_store %arg7[%c0_19, %c0_20], %26 {strides = array<i32>} : memref<16x128xf32, #tpu.memory_space<vmem>>, vector<16x128xf32>,
    } else {
    }
    %c0 = arith.constant 0 : index
    %c0_1 = arith.constant 0 : index
    %3 = vector.load %arg2[%c0, %c0_1] : memref<16x128xbf16, #tpu.memory_space<vmem>>, vector<16x128xbf16>
    %c0_2 = arith.constant 0 : index
    %c0_3 = arith.constant 0 : index
    %4 = vector.load %arg3[%c0_2, %c0_3] : memref<128x128xbf16, #tpu.memory_space<vmem>>, vector<128x128xbf16>
    %cst = arith.constant dense<0.000000e+00> : vector<16x128xf32>
    %5 = tpu.matmul %3, %4, %cst {dimension_numbers = #tpu.dot_dimension_numbers<[1], [0], [0], [1], [0, 0, 1, 1], [], []>} : vector<16x128xbf16>, vector<128x128xbf16>, vector<16x128xf32> -> vector<16x128xf32>
    %c0_4 = arith.constant 0 : index
    %c0_5 = arith.constant 0 : index
    %6 = vector.load %arg4[%c0_4, %c0_5] : memref<1x128xf32, #tpu.memory_space<vmem>>, vector<1x128xf32>
    %7 = vector.broadcast %6 : vector<1x128xf32> to vector<16x128xf32>
    %8 = arith.addf %5, %7 : vector<16x128xf32>
    %cst_6 = arith.constant 5.000000e-01 : f32
    %9 = vector.broadcast %cst_6 : f32 to vector<16x128xf32>
    %10 = arith.mulf %9, %8 : vector<16x128xf32>
    %cst_7 = arith.constant 0.707106769 : f32
    %11 = vector.broadcast %cst_7 : f32 to vector<16x128xf32>
    %12 = arith.mulf %8, %11 : vector<16x128xf32>
    %13 = math.erf %12 : vector<16x128xf32>
    %cst_8 = arith.constant 1.000000e+00 : f32
    %14 = vector.broadcast %cst_8 : f32 to vector<16x128xf32>
    %15 = arith.addf %14, %13 : vector<16x128xf32>
    %16 = arith.mulf %10, %15 : vector<16x128xf32>
    %c0_9 = arith.constant 0 : index
    %c0_10 = arith.constant 0 : index
    %17 = vector.load %arg7[%c0_9, %c0_10] : memref<16x128xf32, #tpu.memory_space<vmem>>, vector<16x128xf32>
    %18 = arith.truncf %16 : vector<16x128xf32> to vector<16x128xbf16>
    %c0_11 = arith.constant 0 : index
    %c0_12 = arith.constant 0 : index
    %19 = vector.load %arg5[%c0_11, %c0_12] : memref<128x128xbf16, #tpu.memory_space<vmem>>, vector<128x128xbf16>
    %cst_13 = arith.constant dense<0.000000e+00> : vector<16x128xf32>
    %20 = tpu.matmul %18, %19, %cst_13 {dimension_numbers = #tpu.dot_dimension_numbers<[1], [0], [0], [1], [0, 0, 1, 1], [], []>} : vector<16x128xbf16>, vector<128x128xbf16>, vector<16x128xf32> -> vector<16x128xf32>
    %21 = arith.addf %17, %20 : vector<16x128xf32>
    %c0_14 = arith.constant 0 : index
    %c0_15 = arith.constant 0 : index
    %22 = vector.load %arg7[%c0_14, %c0_15] : memref<16x128xf32, #tpu.memory_space<vmem>>, vector<16x128xf32>
    tpu.vector_store %arg7[%c0_14, %c0_15], %21 {strides = array<i32>} : memref<16x128xf32, #tpu.memory_space<vmem>>, vector<16x128xf32>,
    %c0_i32_16 = arith.constant 0 : i32
    %23 = arith.cmpi eq, %arg1, %c0_i32_16 : i32
    %24 = arith.extui %23 : i1 to i32
    %c0_i32_17 = arith.constant 0 : i32
    %25 = arith.cmpi ne, %24, %c0_i32_17 : i32
    scf.if %25 {
      %c0_18 = arith.constant 0 : index
      %c0_19 = arith.constant 0 : index
      %26 = vector.load %arg7[%c0_18, %c0_19] : memref<16x128xf32, #tpu.memory_space<vmem>>, vector<16x128xf32>
      %c0_20 = arith.constant 0 : index
      %c0_21 = arith.constant 0 : index
      %27 = vector.load %arg6[%c0_20, %c0_21] : memref<1x128xf32, #tpu.memory_space<vmem>>, vector<1x128xf32>
      %28 = vector.broadcast %27 : vector<1x128xf32> to vector<16x128xf32>
      %29 = arith.addf %26, %28 : vector<16x128xf32>
      %c0_22 = arith.constant 0 : index
      %c0_23 = arith.constant 0 : index
      %30 = vector.load %arg7[%c0_22, %c0_23] : memref<16x128xf32, #tpu.memory_space<vmem>>, vector<16x128xf32>
      tpu.vector_store %arg7[%c0_22, %c0_23], %29 {strides = array<i32>} : memref<16x128xf32, #tpu.memory_space<vmem>>, vector<16x128xf32>,
    } else {
    }
    return
  }
  func.func @transform_0(%arg0: i32, %arg1: i32) -> (i32, i32) {
    %c0_i32 = arith.constant 0 : i32
    %c0_i32_0 = arith.constant 0 : i32
    return %arg0, %c0_i32 : i32, i32
  }
  func.func @transform_1(%arg0: i32, %arg1: i32) -> (i32, i32) {
    %c0_i32 = arith.constant 0 : i32
    %c0_i32_0 = arith.constant 0 : i32
    return %c0_i32, %arg1 : i32, i32
  }
  func.func @transform_2(%arg0: i32, %arg1: i32) -> (i32, i32) {
    %c0_i32 = arith.constant 0 : i32
    %c0_i32_0 = arith.constant 0 : i32
    return %c0_i32, %arg1 : i32, i32
  }
  func.func @transform_3(%arg0: i32, %arg1: i32) -> (i32, i32) {
    %c0_i32 = arith.constant 0 : i32
    %c0_i32_0 = arith.constant 0 : i32
    return %arg1, %c0_i32 : i32, i32
  }
  func.func @transform_4(%arg0: i32, %arg1: i32) -> (i32, i32) {
    %c0_i32 = arith.constant 0 : i32
    %c0_i32_0 = arith.constant 0 : i32
    %c0_i32_1 = arith.constant 0 : i32
    return %c0_i32, %c0_i32_0 : i32, i32
  }
  func.func @transform_5(%arg0: i32, %arg1: i32) -> (i32, i32) {
    %c0_i32 = arith.constant 0 : i32
    %c0_i32_0 = arith.constant 0 : i32
    return %arg0, %c0_i32 : i32, i32
  }
}

</mosaic_0001>

<bundles_post_ra>
// kernel: tpu_custom_call.1
= control target key start
LH: loop header
LB: loop body
LE: loop exit
PB: predicated region body
PF: predicated region fallthrough
CT: control target
= control target key end

     0   :  { %10 = vsyncpa [#allocation3], 0  ;;  %s657_s0 = inlined_call_operand.hbm [shape: bf16[16,128], index: 0, kind: input, shape index: {}]   ;;  %s658_s1 = inlined_call_operand.hbm [shape: bf16[128,128], index: 1, kind: input, shape index: {}]   ;;  %s659_s2 = inlined_call_operand.vmem [shape: f32[1,128], index: 2, kind: input, shape index: {}]   ;;  %s660_s3 = inlined_call_operand.hbm [shape: bf16[128,128], index: 3, kind: input, shape index: {}]   ;;  %s661_s4 = inlined_call_operand.vmem [shape: f32[1,128], index: 4, kind: input, shape index: {}]   ;;  %s662_s5 = inlined_call_operand.hbm [shape: f32[16,128], index: 5, kind: output, shape index: {}]  }
   0x1   :  { %11 = vsyncpa [#allocation6], 0 }
   0x2   :  { %12 = vsyncpa [#allocation4], 0  ;;  %s547_s18 = smov [#allocation5]   ;;  %s548_s20 = smov [#allocation2]  }
   0x3   :  { %s30_s19 = sshll.u32 %s547_s18, 4  ;;  %s18_s21 = sshll.u32 %s548_s20, 4  ;;  %s31_s19 = int_to_ptr.vmem [resolvable:$true] %s30_s19  ;;  %s587_s21 = int_to_ptr.vmem [resolvable:$true] %s18_s21 }
   0x4   :  { %s453_s24 = scalar_lea.hbm %s658_s1, 1024 }
   0x5   :  { %p454_p0 = scmp.ne.s32.totalorder %s658_s1, %s453_s24  ;;  %p457_p1 = scmp.lt.u32.totalorder %s453_s24, %s658_s1 }
   0x7   :  { %p459_p2 = pnand %p457_p1, %p454_p0 }
   0x9   :  { %462 = shalt.err (!%p459_p2)
}
   0xa   :  { %s463_s29 = scalar_lea.vmem %s31_s19, 1024  ;;  %p468_p4 = scmp.lt.s32.totalorder %s31_s19, %s31_s19 }
   0xb   :  { %p464_p3 = scmp.ne.s32.totalorder %s31_s19, %s463_s29  ;;  %p469_p5 = scmp.lt.s32.totalorder %s463_s29, %s463_s29 }
   0xd   :  { %p470_p6 = por %p469_p5, %p468_p4 }
   0xf   :  { %p471_p7 = pnand %p470_p6, %p464_p3 }
  0x11   :  { %474 = shalt.err (!%p471_p7)
}
  0x12   :  { %s549_s30 = smov 64   ;;  %s550_s6 = smov 4  }
  0x13   :  { %36 = dma.hbm_to_vmem [thread:$0]  %s658_s1, 1024, %s31_s19, [#allocation6], %s549_s30, %s549_s30, %s550_s6  }
  0x14   :  { %s475_s11 = scalar_lea.hbm %s657_s0, 128 }
  0x15   :  { %p476_p8 = scmp.ne.s32.totalorder %s657_s0, %s475_s11  ;;  %p479_p9 = scmp.lt.u32.totalorder %s475_s11, %s657_s0 }
  0x17   :  { %p481_p10 = pnand %p479_p9, %p476_p8 }
  0x19   :  { %484 = shalt.err (!%p481_p10)
}
  0x1a   :  { %s485_s16 = scalar_lea.vmem %s587_s21, 128  ;;  %p490_p12 = scmp.lt.s32.totalorder %s587_s21, %s587_s21 }
  0x1b   :  { %p486_p11 = scmp.ne.s32.totalorder %s587_s21, %s485_s16  ;;  %p491_p13 = scmp.lt.s32.totalorder %s485_s16, %s485_s16 }
  0x1d   :  { %p492_p0 = por %p491_p13, %p490_p12 }
  0x1f   :  { %p493_p1 = pnand %p492_p0, %p486_p11 }
  0x21   :  { %496 = shalt.err (!%p493_p1)
}
  0x22   :  { %24 = dma.hbm_to_vmem [thread:$0]  %s657_s0, 128, %s587_s21, [#allocation3], %s549_s30, %s549_s30, %s550_s6  }
  0x23   :  { %s551_s18 = smov [#allocation7]   ;;  %s497_s23 = scalar_lea.hbm %s660_s3, 1024 }
  0x24   :  { %s44_s19 = sshll.u32 %s551_s18, 4  ;;  %p498_p2 = scmp.ne.s32.totalorder %s660_s3, %s497_s23  ;;  %s45_s19 = int_to_ptr.vmem [resolvable:$true] %s44_s19 }
  0x25   :  { %p501_p3 = scmp.lt.u32.totalorder %s497_s23, %s660_s3 }
  0x27   :  { %p503_p4 = pnand %p501_p3, %p498_p2 }
  0x29   :  { %506 = shalt.err (!%p503_p4)
}
  0x2a   :  { %s507_s28 = scalar_lea.vmem %s45_s19, 1024  ;;  %p512_p6 = scmp.lt.s32.totalorder %s45_s19, %s45_s19 }
  0x2b   :  { %p508_p5 = scmp.ne.s32.totalorder %s45_s19, %s507_s28  ;;  %p513_p7 = scmp.lt.s32.totalorder %s507_s28, %s507_s28 }
  0x2d   :  { %p514_p8 = por %p513_p7, %p512_p6 }
  0x2f   :  { %p515_p9 = pnand %p514_p8, %p508_p5 }
  0x31   :  { %518 = shalt.err (!%p515_p9)
}
  0x32   :  { %50 = dma.hbm_to_vmem [thread:$0]  %s660_s3, 1024, %s45_s19, [#allocation6], %s549_s30, %s549_s30, %s550_s6  }
  0x33   :  { %541 = dma.done.wait [#allocation3], 128  }
  0x34   :  { %542 = vsyncadd [#allocation3], 4294967168 }
  0x35   :  { %543 = dma.done.wait [#allocation6], 2048  }
  0x36   :  { %544 = vsyncadd [#allocation6], 4294965248  ;;  %v552_v0 = vmov 0.0   ;;  %vm553_vm0 = vmmov 0   ;;  %v432_v1 = vld [vmem:[#allocation5] sm:$0xff]   ;;  %v433_v2 = vld [vmem:[#allocation5 + $0x8] sm:$0xff]  }
  0x37   :  { %382 = vmatprep.subr.bf16.mxu0 %v552_v0  ;;  %398 = vmatprep.mubr.msk.bf16.mxu0 %vm553_vm0, %v552_v0  ;;  %v434_v3 = vld [vmem:[#allocation5 + $0x10] sm:$0xff]   ;;  %v441_v4 = vld [vmem:[#allocation7] sm:$0xff]   ;;  %v435_v5 = vld [vmem:[#allocation5 + $0x18] sm:$0xff]   ;;  %s554_s6 = smov [#allocation8]  }
  0x38   :  { %402 = vmatprep.subr.bf16.mxu1 %v552_v0  ;;  %418 = vmatprep.mubr.msk.bf16.mxu1 %vm553_vm0, %v552_v0  ;;  %v442_v6 = vld [vmem:[#allocation7 + $0x8] sm:$0xff]   ;;  %v436_v7 = vld [vmem:[#allocation5 + $0x20] sm:$0xff]   ;;  %v438_v9 = vld [vmem:[#allocation5 + $0x30] sm:$0xff]   ;;  %s332_s7 = sshll.u32 %s554_s6, 4  ;;  %s333_s7 = int_to_ptr.vmem [resolvable:$true] %s332_s7 }
  0x39   :  { %383 = vmatpush3.bf16.msra.mxu0 %v432_v1  ;;  %403 = vmatpush3.bf16.msra.mxu1 %v441_v4  ;;  %v437_v8 = vld [vmem:[#allocation5 + $0x28] sm:$0xff]   ;;  %v439_v10 = vld [vmem:[#allocation5 + $0x38] sm:$0xff]   ;;  %v443_v12 = vld [vmem:[#allocation7 + $0x10] sm:$0xff]   ;;  %s519_s8 = scalar_lea.vmem %s333_s7, 256  ;;  %p524_p11 = scmp.lt.s32.totalorder %s333_s7, %s333_s7 }
  0x3a   :  { %384 = vmatprep.subr.bf16.mxu0 %v552_v0  ;;  %404 = vmatprep.subr.bf16.mxu1 %v552_v0  ;;  %v440_v11 = vld [vmem:[#allocation2] sm:$0xff]   ;;  %v445_v14 = vld [vmem:[#allocation7 + $0x20] sm:$0xff]   ;;  %v446_v15 = vld [vmem:[#allocation7 + $0x28] sm:$0xff]   ;;  %p520_p10 = scmp.ne.s32.totalorder %s333_s7, %s519_s8  ;;  %p525_p12 = scmp.lt.s32.totalorder %s519_s8, %s519_s8 }
  0x3b   :  { %v444_v13 = vld [vmem:[#allocation7 + $0x18] sm:$0xff]   ;;  %v447_v16 = vld [vmem:[#allocation7 + $0x30] sm:$0xff]  }
  0x3c   :  { %v448_v17 = vld [vmem:[#allocation7 + $0x38] sm:$0xff]   ;;  %p526_p13 = por %p525_p12, %p524_p11 }
  0x3d   :  { %385 = vmatpush3.bf16.msra.mxu0 %v433_v2  ;;  %405 = vmatpush3.bf16.msra.mxu1 %v442_v6  ;;  %v345_v18 = vld [vmem:[%s659_s2] ss:$0 sm:$0xff] }
  0x3e   :  { %386 = vmatprep.subr.bf16.mxu0 %v552_v0  ;;  %406 = vmatprep.subr.bf16.mxu1 %v552_v0  ;;  %v363_v37 = vld [vmem:[%s661_s4] ss:$0 sm:$0xff]  ;;  %p527_p0 = pnand %p526_p13, %p520_p10 }
  0x41   :  { %387 = vmatpush3.bf16.msra.mxu0 %v434_v3  ;;  %407 = vmatpush3.bf16.msra.mxu1 %v443_v12 }
  0x42   :  { %388 = vmatprep.subr.bf16.mxu0 %v552_v0  ;;  %408 = vmatprep.subr.bf16.mxu1 %v552_v0 }
  0x45   :  { %389 = vmatpush3.bf16.msra.mxu0 %v435_v5  ;;  %409 = vmatpush3.bf16.msra.mxu1 %v444_v13 }
  0x46   :  { %390 = vmatprep.subr.bf16.mxu0 %v552_v0  ;;  %410 = vmatprep.subr.bf16.mxu1 %v552_v0 }
  0x49   :  { %391 = vmatpush3.bf16.msra.mxu0 %v436_v7  ;;  %411 = vmatpush3.bf16.msra.mxu1 %v445_v14 }
  0x4a   :  { %392 = vmatprep.subr.bf16.mxu0 %v552_v0  ;;  %412 = vmatprep.subr.bf16.mxu1 %v552_v0 }
  0x4d   :  { %393 = vmatpush3.bf16.msra.mxu0 %v437_v8  ;;  %413 = vmatpush3.bf16.msra.mxu1 %v446_v15 }
  0x4e   :  { %394 = vmatprep.subr.bf16.mxu0 %v552_v0  ;;  %414 = vmatprep.subr.bf16.mxu1 %v552_v0 }
  0x51   :  { %395 = vmatpush3.bf16.msra.mxu0 %v438_v9  ;;  %415 = vmatpush3.bf16.msra.mxu1 %v447_v16 }
  0x52   :  { %396 = vmatprep.subr.bf16.mxu0 %v552_v0  ;;  %416 = vmatprep.subr.bf16.mxu1 %v552_v0 }
  0x55   :  { %397 = vmatpush3.bf16.msra.mxu0 %v439_v10  ;;  %417 = vmatpush3.bf16.msra.mxu1 %v448_v17 }
  0x58   :  { %399 = vmatmul.mubr.bf16.vlgmr.msra.gmra.mrb[0].mxu0 %v440_v11 }
 0x12b   :  { %v182_v19 = vpop.f32.mrb[0].mxu0 }
 0x12c   :  { %v183_v20 = vadd.f32 %v345_v18, %v182_v19  ;;  %v400_v21 = vpop.f32.mrb[1].mxu0 }
 0x12d   :  { %v185_v22 = vpop.f32.mrb[2].mxu0 }
 0x12e   :  { %v191_v23 = vmul.f32 0.70710677, %v183_v20  ;;  %v186_v24 = vadd.f32 %v345_v18, %v185_v22  ;;  %v401_v25 = vpop.f32.mrb[3].mxu0  ;;  %v189_v30 = vmul.f32 0.5, %v183_v20 }
 0x130   :  { %449 = verf.f32 %v191_v23  ;;  %v192_v26 = vmul.f32 0.70710677, %v186_v24  ;;  %v190_v31 = vmul.f32 0.5, %v186_v24 }
 0x132   :  { %451 = verf.f32 %v192_v26 }
 0x13a   :  { %v450_v27 = vpop.eup %449 }
 0x13b   :  { %v195_v28 = vadd.f32 1.0, %v450_v27 }
 0x13c   :  { %v452_v29 = vpop.eup %451 }
 0x13d   :  { %v196_v32 = vadd.f32 1.0, %v452_v29  ;;  %v197_v33 = vmul.f32 %v195_v28, %v189_v30 }
 0x13f   :  { %v198_v34 = vmul.f32 %v196_v32, %v190_v31 }
 0x141   :  { %v201_v35 = vpack.c.bf16 %v198_v34, %v197_v33 }
 0x143   :  { %419 = vmatmul.mubr.bf16.vlgmr.msra.gmra.mrb[0].mxu1 %v201_v35 }
 0x216   :  { %v300_v36 = vpop.f32.mrb[0].mxu1 }
 0x217   :  { %v420_v38 = vpop.f32.mrb[1].mxu1  ;;  %v323_v41 = vadd.f32 %v363_v37, %v300_v36 }
 0x218   :  { %v303_v39 = vpop.f32.mrb[2].mxu1 }
 0x219   :  { %v421_v40 = vpop.f32.mrb[3].mxu1  ;;  %v324_v42 = vadd.f32 %v363_v37, %v303_v39  ;;  %325 = vst [vmem:[#allocation8] sm:$0xff] %v323_v41 }
 0x21b   :  { %326 = vst [vmem:[#allocation8 + $0x8] sm:$0xff] %v324_v42 }
 0x21c   :  { %530 = shalt.err (!%p527_p0)
}
 0x21d   :  { %s531_s4 = scalar_lea.hbm %s662_s5, 256 }
 0x21e   :  { %p532_p1 = scmp.ne.s32.totalorder %s662_s5, %s531_s4  ;;  %p535_p2 = scmp.lt.u32.totalorder %s531_s4, %s662_s5 }
 0x220   :  { %p537_p3 = pnand %p535_p2, %p532_p1 }
 0x222   :  { %540 = shalt.err (!%p537_p3)
}
 0x223   :  { %s555_s15 = smov 128   ;;  %s556_s16 = smov 8  }
 0x224   :  { %338 = dma.vmem_to_hbm [thread:$0]  %s333_s7, 256, %s662_s5, [#allocation4], %s555_s15, %s555_s15, %s556_s16  }
 0x225   :  { %545 = dma.done.wait [#allocation4], 256  }
 0x226   :  { %546 = vsyncadd [#allocation4], 4294967040 }
 0x227   :  { %342 = vsyncpa [#allocation3], 1 }
 0x228   :  { %343 = vsyncpa [#allocation6], 1 }
 0x229   :  { %344 = vsyncpa [#allocation4], 1 }

</bundles_post_ra>
